<compile_context>
chip_gen: v7x
topology: tpu7x:2x2x1
jax: 0.10.0
libtpu: 0.0.40
codegen_flags: <defaults>
</compile_context>

<pallas_src>
import functools

import jax
import jax.numpy as jnp
from jax.experimental import pallas as pl
from jax.experimental.pallas import tpu as pltpu


_DEF_EPS = 1e-5


# --------------------------------------------------------------------------
# VMEM budgeting / row-tile selection
# --------------------------------------------------------------------------
def _vmem_estimate_bytes(tm, d, dout):
    item = 4  # f32
    io = 2 * tm * d * item + 2 * tm * dout * item          # double-buffered x / out
    resident = d * dout * item + 2 * d * item + dout * item  # W, gamma, beta, bias
    scratch = 2 * tm * max(d, dout) * item                  # f32 temporaries
    return io + resident + scratch


def _pick_row_tile(n_rows, d, dout, budget_bytes=32 * 1024 * 1024):
    tm = 512
    while tm > 8 and _vmem_estimate_bytes(tm, d, dout) > budget_bytes:
        tm //= 2
    tm = min(tm, n_rows)
    tm = max(8, (tm // 8) * 8)  # keep sublane-aligned
    return tm


def _compiler_params(tm, d, dout):
    vmem_limit = int(min(64 * 1024 * 1024,               # never above v7x physical
                         max(8 * 1024 * 1024,
                             2 * _vmem_estimate_bytes(tm, d, dout))))
    return pltpu.CompilerParams(
        dimension_semantics=("parallel",),
        vmem_limit_bytes=vmem_limit,
    )


# --------------------------------------------------------------------------
# Fused kernel: y = LayerNorm(x) @ W + bias  on one (TM, D) row tile.
# --------------------------------------------------------------------------
def _fused_prenorm_linear_kernel(x_ref, g_ref, b_ref, w_ref, bias_ref, o_ref, *, eps):
    x = x_ref[...].astype(jnp.float32)                    # (TM, D), D on lanes
    inv_d = jnp.float32(1.0 / x.shape[-1])

    # One-pass statistics: a single cross-lane reduction sweep over the tile.
    s = jnp.sum(x, axis=-1, keepdims=True)
    s2 = jnp.sum(x * x, axis=-1, keepdims=True)
    mean = s * inv_d
    var = s2 * inv_d - mean * mean

    x_hat = (x - mean) * jax.lax.rsqrt(var + eps)          # rsqrt -> EUP slot
    y = x_hat * g_ref[...].astype(jnp.float32) + b_ref[...].astype(jnp.float32)

    # fn = Linear(D, Dout): MXU matmul against the VMEM-resident weight tile.
    acc = jnp.dot(y, w_ref[...].astype(jnp.float32),
                  preferred_element_type=jnp.float32)
    o_ref[...] = (acc + bias_ref[...].astype(jnp.float32)).astype(o_ref.dtype)


def prenorm_linear(x, gamma, beta, w, bias, *, eps=_DEF_EPS):
    """Fused PreNorm(dim, Linear) forward: Linear(LayerNorm(x)).

    x: (B, S, D); gamma/beta: (1, D); w: (D, Dout); bias: (1, Dout).
    """
    B, S, D = x.shape
    Dout = w.shape[1]
    R = B * S
    x2d = x.reshape(R, D)

    tm = _pick_row_tile(R, D, Dout)
    r_pad = pl.cdiv(R, tm) * tm
    if r_pad != R:
        x2d = jnp.pad(x2d, ((0, r_pad - R), (0, 0)))       # zero rows are LN-safe

    kernel = functools.partial(_fused_prenorm_linear_kernel, eps=eps)
    out2d = pl.pallas_call(
        kernel,
        out_shape=jax.ShapeDtypeStruct((r_pad, Dout), x.dtype),
        grid=(r_pad // tm,),
        in_specs=[
            pl.BlockSpec((tm, D), lambda i: (i, 0)),        # x: row-tiled
            pl.BlockSpec((1, D), lambda i: (0, 0)),         # gamma: resident
            pl.BlockSpec((1, D), lambda i: (0, 0)),         # beta: resident
            pl.BlockSpec((D, Dout), lambda i: (0, 0)),      # W: resident
            pl.BlockSpec((1, Dout), lambda i: (0, 0)),      # bias: resident
        ],
        out_specs=pl.BlockSpec((tm, Dout), lambda i: (i, 0)),
        compiler_params=_compiler_params(tm, D, Dout),
    )(x2d, gamma, beta, w, bias)

    return out2d[:R].reshape(B, S, Dout)


# --------------------------------------------------------------------------
# Standalone row-tiled LayerNorm kernel (for wrapping an arbitrary `fn`).
# --------------------------------------------------------------------------
def _layernorm_kernel(x_ref, g_ref, b_ref, o_ref, *, eps):
    x = x_ref[...].astype(jnp.float32)
    inv_d = jnp.float32(1.0 / x.shape[-1])
    s = jnp.sum(x, axis=-1, keepdims=True)
    s2 = jnp.sum(x * x, axis=-1, keepdims=True)
    mean = s * inv_d
    var = s2 * inv_d - mean * mean
    x_hat = (x - mean) * jax.lax.rsqrt(var + eps)
    y = x_hat * g_ref[...].astype(jnp.float32) + b_ref[...].astype(jnp.float32)
    o_ref[...] = y.astype(o_ref.dtype)


def pallas_layernorm(x, gamma, beta, *, eps=_DEF_EPS):
    """LayerNorm over the trailing dim of x (any leading shape)."""
    orig_shape = x.shape
    D = orig_shape[-1]
    x2d = x.reshape(-1, D)
    R = x2d.shape[0]

    tm = _pick_row_tile(R, D, D)
    r_pad = pl.cdiv(R, tm) * tm
    if r_pad != R:
        x2d = jnp.pad(x2d, ((0, r_pad - R), (0, 0)))

    kernel = functools.partial(_layernorm_kernel, eps=eps)
    out2d = pl.pallas_call(
        kernel,
        out_shape=jax.ShapeDtypeStruct((r_pad, D), x.dtype),
        grid=(r_pad // tm,),
        in_specs=[
            pl.BlockSpec((tm, D), lambda i: (i, 0)),
            pl.BlockSpec((1, D), lambda i: (0, 0)),
            pl.BlockSpec((1, D), lambda i: (0, 0)),
        ],
        out_specs=pl.BlockSpec((tm, D), lambda i: (i, 0)),
        compiler_params=_compiler_params(tm, D, D),
    )(x2d, gamma, beta)

    return out2d[:R].reshape(orig_shape)


def pre_norm(x, gamma, beta, fn, **kwargs):
    """Generic PreNorm: fn(LayerNorm(x), **kwargs) with the LN as a Pallas kernel."""
    return fn(pallas_layernorm(x, gamma, beta), **kwargs)


# --------------------------------------------------------------------------
# Demo / correctness check
# --------------------------------------------------------------------------
if __name__ == "__main__":
    key = jax.random.PRNGKey(0)
    B, S, D = 2, 64, 128          # lane-dense hidden dim (multiple of 128)
    Dout = D

    k_x, k_w, k_b = jax.random.split(key, 3)
    x = jax.random.normal(k_x, (B, S, D), dtype=jnp.float32)

    # LayerNorm params (torch default init: gamma=1, beta=0).
    gamma = jnp.ones((1, D), dtype=jnp.float32)
    beta = jnp.zeros((1, D), dtype=jnp.float32)

    # The wrapped `fn` = Linear(dim, dim), deterministic synthetic weights.
    w = jax.random.normal(k_w, (D, Dout), dtype=jnp.float32) * 0.02
    bias = jax.random.normal(k_b, (1, Dout), dtype=jnp.float32) * 0.02

    # Fused path (fn = Linear).
    out = jax.block_until_ready(prenorm_linear(x, gamma, beta, w, bias))

    # Generic PreNorm path (arbitrary fn) — uses the standalone LN kernel.
    def fn(z):
        return z @ w + bias.reshape(1, 1, Dout)

    out_generic = jax.block_until_ready(pre_norm(x, gamma, beta, fn))

    # Plain-JAX reference (two-pass LayerNorm, matches torch.nn.LayerNorm).
    mean = jnp.mean(x, axis=-1, keepdims=True)
    var = jnp.mean((x - mean) ** 2, axis=-1, keepdims=True)
    x_hat = (x - mean) / jnp.sqrt(var + _DEF_EPS)
    ref = (x_hat * gamma.reshape(1, 1, D) + beta.reshape(1, 1, D)) @ w \
        + bias.reshape(1, 1, Dout)

    assert out.shape == (B, S, Dout)
    assert jnp.allclose(out, ref, atol=1e-4, rtol=1e-4), \
        float(jnp.max(jnp.abs(out - ref)))
    assert jnp.allclose(out_generic, ref, atol=1e-4, rtol=1e-4), \
        float(jnp.max(jnp.abs(out_generic - ref)))

    print("KERNEL_OK")
</pallas_src>

<mosaic_0001>
module attributes {stable_mosaic.version = 11 : i64} {
  func.func @_fused_prenorm_linear_kernel(%arg0: i32, %arg1: memref<128x128xf32, #tpu.memory_space<vmem>>, %arg2: memref<1x128xf32, #tpu.memory_space<vmem>>, %arg3: memref<1x128xf32, #tpu.memory_space<vmem>>, %arg4: memref<128x128xf32, #tpu.memory_space<vmem>>, %arg5: memref<1x128xf32, #tpu.memory_space<vmem>>, %arg6: memref<128x128xf32, #tpu.memory_space<vmem>>) attributes {dimension_semantics = [#tpu.dimension_semantics<parallel>], iteration_bounds = array<i64: 1>, scalar_prefetch = 0 : i64, scratch_operands = 0 : i64, tpu.core_type = #tpu.core_type<tc>, window_params = [{transform_indices = @transform_0, window_bounds = array<i64: 128, 128>}, {pipeline_mode = #tpu.pipeline_mode<synchronous>, transform_indices = @transform_1, window_bounds = array<i64: 1, 128>}, {pipeline_mode = #tpu.pipeline_mode<synchronous>, transform_indices = @transform_2, window_bounds = array<i64: 1, 128>}, {pipeline_mode = #tpu.pipeline_mode<synchronous>, transform_indices = @transform_3, window_bounds = array<i64: 128, 128>}, {pipeline_mode = #tpu.pipeline_mode<synchronous>, transform_indices = @transform_4, window_bounds = array<i64: 1, 128>}, {transform_indices = @transform_5, window_bounds = array<i64: 128, 128>}]} {
    %c0 = arith.constant 0 : index
    %c0_0 = arith.constant 0 : index
    %0 = vector.load %arg1[%c0, %c0_0] : memref<128x128xf32, #tpu.memory_space<vmem>>, vector<128x128xf32>
    %cst = arith.constant dense<0.000000e+00> : vector<128xf32>
    %1 = vector.multi_reduction <add>, %0, %cst [1] : vector<128x128xf32> to vector<128xf32>
    %2 = vector.shape_cast %1 : vector<128xf32> to vector<128x1xf32>
    %3 = arith.mulf %0, %0 : vector<128x128xf32>
    %cst_1 = arith.constant dense<0.000000e+00> : vector<128xf32>
    %4 = vector.multi_reduction <add>, %3, %cst_1 [1] : vector<128x128xf32> to vector<128xf32>
    %5 = vector.shape_cast %4 : vector<128xf32> to vector<128x1xf32>
    %cst_2 = arith.constant 7.812500e-03 : f32
    %6 = vector.broadcast %cst_2 : f32 to vector<128x1xf32>
    %7 = arith.mulf %2, %6 : vector<128x1xf32>
    %cst_3 = arith.constant 7.812500e-03 : f32
    %8 = vector.broadcast %cst_3 : f32 to vector<128x1xf32>
    %9 = arith.mulf %5, %8 : vector<128x1xf32>
    %10 = arith.mulf %7, %7 : vector<128x1xf32>
    %11 = arith.subf %9, %10 : vector<128x1xf32>
    %12 = vector.broadcast %7 : vector<128x1xf32> to vector<128x128xf32>
    %13 = arith.subf %0, %12 : vector<128x128xf32>
    %cst_4 = arith.constant 9.99999974E-6 : f32
    %14 = vector.broadcast %cst_4 : f32 to vector<128x1xf32>
    %15 = arith.addf %11, %14 : vector<128x1xf32>
    %16 = math.rsqrt %15 : vector<128x1xf32>
    %17 = vector.broadcast %16 : vector<128x1xf32> to vector<128x128xf32>
    %18 = arith.mulf %13, %17 : vector<128x128xf32>
    %c0_5 = arith.constant 0 : index
    %c0_6 = arith.constant 0 : index
    %19 = vector.load %arg2[%c0_5, %c0_6] : memref<1x128xf32, #tpu.memory_space<vmem>>, vector<1x128xf32>
    %20 = vector.broadcast %19 : vector<1x128xf32> to vector<128x128xf32>
    %21 = arith.mulf %18, %20 : vector<128x128xf32>
    %c0_7 = arith.constant 0 : index
    %c0_8 = arith.constant 0 : index
    %22 = vector.load %arg3[%c0_7, %c0_8] : memref<1x128xf32, #tpu.memory_space<vmem>>, vector<1x128xf32>
    %23 = vector.broadcast %22 : vector<1x128xf32> to vector<128x128xf32>
    %24 = arith.addf %21, %23 : vector<128x128xf32>
    %c0_9 = arith.constant 0 : index
    %c0_10 = arith.constant 0 : index
    %25 = vector.load %arg4[%c0_9, %c0_10] : memref<128x128xf32, #tpu.memory_space<vmem>>, vector<128x128xf32>
    %cst_11 = arith.constant dense<0.000000e+00> : vector<128x128xf32>
    %26 = tpu.matmul %24, %25, %cst_11 {dimension_numbers = #tpu.dot_dimension_numbers<[1], [0], [0], [1], [0, 0, 1, 1], [], []>} : vector<128x128xf32>, vector<128x128xf32>, vector<128x128xf32> -> vector<128x128xf32>
    %c0_12 = arith.constant 0 : index
    %c0_13 = arith.constant 0 : index
    %27 = vector.load %arg5[%c0_12, %c0_13] : memref<1x128xf32, #tpu.memory_space<vmem>>, vector<1x128xf32>
    %28 = vector.broadcast %27 : vector<1x128xf32> to vector<128x128xf32>
    %29 = arith.addf %26, %28 : vector<128x128xf32>
    %c0_14 = arith.constant 0 : index
    %c0_15 = arith.constant 0 : index
    %30 = vector.load %arg6[%c0_14, %c0_15] : memref<128x128xf32, #tpu.memory_space<vmem>>, vector<128x128xf32>
    tpu.vector_store %arg6[%c0_14, %c0_15], %29 {strides = array<i32>} : memref<128x128xf32, #tpu.memory_space<vmem>>, vector<128x128xf32>,
    return
  }
  func.func @transform_0(%arg0: i32) -> (i32, i32) {
    %c0_i32 = arith.constant 0 : i32
    %c0_i32_0 = arith.constant 0 : i32
    return %arg0, %c0_i32 : i32, i32
  }
  func.func @transform_1(%arg0: i32) -> (i32, i32) {
    %c0_i32 = arith.constant 0 : i32
    %c0_i32_0 = arith.constant 0 : i32
    %c0_i32_1 = arith.constant 0 : i32
    return %c0_i32, %c0_i32_0 : i32, i32
  }
  func.func @transform_2(%arg0: i32) -> (i32, i32) {
    %c0_i32 = arith.constant 0 : i32
    %c0_i32_0 = arith.constant 0 : i32
    %c0_i32_1 = arith.constant 0 : i32
    return %c0_i32, %c0_i32_0 : i32, i32
  }
  func.func @transform_3(%arg0: i32) -> (i32, i32) {
    %c0_i32 = arith.constant 0 : i32
    %c0_i32_0 = arith.constant 0 : i32
    %c0_i32_1 = arith.constant 0 : i32
    return %c0_i32, %c0_i32_0 : i32, i32
  }
  func.func @transform_4(%arg0: i32) -> (i32, i32) {
    %c0_i32 = arith.constant 0 : i32
    %c0_i32_0 = arith.constant 0 : i32
    %c0_i32_1 = arith.constant 0 : i32
    return %c0_i32, %c0_i32_0 : i32, i32
  }
  func.func @transform_5(%arg0: i32) -> (i32, i32) {
    %c0_i32 = arith.constant 0 : i32
    %c0_i32_0 = arith.constant 0 : i32
    return %arg0, %c0_i32 : i32, i32
  }
}

</mosaic_0001>

<bundles_post_ra>
// kernel: tpu_custom_call.1
= control target key start
LH: loop header
LB: loop body
LE: loop exit
PB: predicated region body
PF: predicated region fallthrough
CT: control target
= control target key end

     0   :  { %10 = vsyncpa [#allocation3], 0  ;;  %s1045_s0 = inlined_call_operand.hbm [shape: f32[128,128], index: 0, kind: input, shape index: {}]   ;;  %s1046_s1 = inlined_call_operand.vmem [shape: f32[1,128], index: 1, kind: input, shape index: {}]   ;;  %s1047_s2 = inlined_call_operand.vmem [shape: f32[1,128], index: 2, kind: input, shape index: {}]   ;;  %s1048_s3 = inlined_call_operand.hbm [shape: f32[128,128], index: 3, kind: input, shape index: {}]   ;;  %s1049_s4 = inlined_call_operand.vmem [shape: f32[1,128], index: 4, kind: input, shape index: {}]   ;;  %s1050_s5 = inlined_call_operand.hbm [shape: f32[128,128], index: 5, kind: output, shape index: {}]  }
   0x1   :  { %11 = vsyncpa [#allocation6], 0 }
   0x2   :  { %12 = vsyncpa [#allocation4], 0  ;;  %s769_s18 = smov [#allocation2]   ;;  %s697_s22 = scalar_lea.hbm %s1045_s0, 2048 }
   0x3   :  { %s18_s19 = sshll.u32 %s769_s18, 4  ;;  %p698_p0 = scmp.ne.s32.totalorder %s1045_s0, %s697_s22  ;;  %s19_s19 = int_to_ptr.vmem [resolvable:$true] %s18_s19 }
   0x4   :  { %p701_p1 = scmp.lt.u32.totalorder %s697_s22, %s1045_s0 }
   0x6   :  { %p703_p2 = pnand %p701_p1, %p698_p0 }
   0x8   :  { %706 = shalt.err (!%p703_p2)
}
   0x9   :  { %s707_s27 = scalar_lea.vmem %s19_s19, 2048  ;;  %p712_p4 = scmp.lt.s32.totalorder %s19_s19, %s19_s19 }
   0xa   :  { %p708_p3 = scmp.ne.s32.totalorder %s19_s19, %s707_s27  ;;  %p713_p5 = scmp.lt.s32.totalorder %s707_s27, %s707_s27 }
   0xc   :  { %p714_p6 = por %p713_p5, %p712_p4 }
   0xe   :  { %p715_p7 = pnand %p714_p6, %p708_p3 }
  0x10   :  { %718 = shalt.err (!%p715_p7)
}
  0x11   :  { %s770_s28 = smov 128   ;;  %s771_s29 = smov 8  }
  0x12   :  { %24 = dma.hbm_to_vmem [thread:$0]  %s1045_s0, 2048, %s19_s19, [#allocation3], %s770_s28, %s770_s28, %s771_s29  }
  0x13   :  { %s772_s7 = smov [#allocation5]   ;;  %s719_s11 = scalar_lea.hbm %s1048_s3, 2048 }
  0x14   :  { %s34_s8 = sshll.u32 %s772_s7, 4  ;;  %p720_p8 = scmp.ne.s32.totalorder %s1048_s3, %s719_s11  ;;  %s35_s8 = int_to_ptr.vmem [resolvable:$true] %s34_s8 }
  0x15   :  { %p723_p9 = scmp.lt.u32.totalorder %s719_s11, %s1048_s3 }
  0x17   :  { %p725_p10 = pnand %p723_p9, %p720_p8 }
  0x19   :  { %728 = shalt.err (!%p725_p10)
}
  0x1a   :  { %s729_s16 = scalar_lea.vmem %s35_s8, 2048  ;;  %p734_p12 = scmp.lt.s32.totalorder %s35_s8, %s35_s8 }
  0x1b   :  { %p730_p11 = scmp.ne.s32.totalorder %s35_s8, %s729_s16  ;;  %p735_p13 = scmp.lt.s32.totalorder %s729_s16, %s729_s16 }
  0x1d   :  { %p736_p0 = por %p735_p13, %p734_p12 }
  0x1f   :  { %p737_p1 = pnand %p736_p0, %p730_p11 }
  0x21   :  { %740 = shalt.err (!%p737_p1)
}
  0x22   :  { %40 = dma.hbm_to_vmem [thread:$0]  %s1048_s3, 2048, %s35_s8, [#allocation6], %s770_s28, %s770_s28, %s771_s29  }
  0x23   :  { %763 = dma.done.wait [#allocation3], 2048  }
  0x24   :  { %764 = vsyncadd [#allocation3], 4294965248 }
  0x25   :  { %765 = dma.done.wait [#allocation6], 2048  }
  0x26   :  { %766 = vsyncadd [#allocation6], 4294965248  ;;  %v834_v0 = vld [vmem:[#allocation2 + $0x8] sm:$0xff]  ;;  %v836_v1 = vld [vmem:[#allocation2] sm:$0xff] }
  0x27   :  { %67 = vadd.xlane.f32.xlu1 %v834_v0  ;;  %65 = vadd.xlane.f32.xlu0 %v836_v1  ;;  %v840_v2 = vld [vmem:[#allocation2 + $0x48] sm:$0xff]  ;;  %v842_v3 = vld [vmem:[#allocation2 + $0x40] sm:$0xff]  ;;  %v97_v5 = vmul.f32 %v836_v1, %v836_v1  ;;  %v98_v7 = vmul.f32 %v834_v0, %v834_v0  ;;  %v854_v8 = vld [vmem:[#allocation2 + $0x50] sm:$0xff] }
  0x28   :  { %v105_v4 = vmul.f32 %v842_v3, %v842_v3  ;;  %v106_v6 = vmul.f32 %v840_v2, %v840_v2  ;;  %v856_v9 = vld [vmem:[#allocation2 + $0x10] sm:$0xff]  ;;  %v319_v10 = vld [vmem:[#allocation5] sm:$0xff]  ;;  %v320_v11 = vld [vmem:[#allocation5 + $0x8] sm:$0xff]  ;;  %v107_v18 = vmul.f32 %v854_v8, %v854_v8 }
  0x29   :  { %v612_v12 = vpack.c.bf16 %v320_v11, %v319_v10  ;;  %v860_v13 = vld [vmem:[#allocation2 + $0x58] sm:$0xff]  ;;  %v321_v15 = vld [vmem:[#allocation5 + $0x10] sm:$0xff]  ;;  %v99_v19 = vmul.f32 %v856_v9, %v856_v9  ;;  %v323_v20 = vld [vmem:[#allocation5 + $0x20] sm:$0xff] }
  0x2a   :  { %v862_v14 = vld [vmem:[#allocation2 + $0x18] sm:$0xff]  ;;  %v324_v21 = vld [vmem:[#allocation5 + $0x28] sm:$0xff]  ;;  %v108_v22 = vmul.f32 %v860_v13, %v860_v13  ;;  %v325_v25 = vld [vmem:[#allocation5 + $0x30] sm:$0xff] }
  0x2b   :  { %83 = vadd.xlane.f32.xlu1 %v840_v2  ;;  %81 = vadd.xlane.f32.xlu0 %v842_v3  ;;  %v322_v16 = vld [vmem:[#allocation5 + $0x18] sm:$0xff]  ;;  %v100_v23 = vmul.f32 %v862_v14, %v862_v14  ;;  %v620_v24 = vpack.c.bf16 %v324_v21, %v323_v20  ;;  %v874_v28 = vld [vmem:[#allocation2 + $0x60] sm:$0xff]  ;;  %v328_v31 = vld [vmem:[#allocation5 + $0x48] sm:$0xff] }
  0x2c   :  { %613 = vmatprep.subr.bf16.mxu0 %v612_v12  ;;  %644 = vmatprep.subr.bf16.mxu1 %v612_v12  ;;  %v616_v17 = vpack.c.bf16 %v322_v16, %v321_v15  ;;  %v326_v26 = vld [vmem:[#allocation5 + $0x38] sm:$0xff]  ;;  %v876_v29 = vld [vmem:[#allocation2 + $0x20] sm:$0xff]  ;;  %v880_v33 = vld [vmem:[#allocation2 + $0x68] sm:$0xff]  ;;  %v109_v37 = vmul.f32 %v874_v28, %v874_v28 }
  0x2d   :  { %615 = vmatpush3.bf16.msra.mxu0 %v612_v12  ;;  %652 = vmatpush3.bf16.msra.mxu1 %v612_v12  ;;  %v624_v27 = vpack.c.bf16 %v326_v26, %v325_v25  ;;  %v327_v30 = vld [vmem:[#allocation5 + $0x40] sm:$0xff]  ;;  %v882_v34 = vld [vmem:[#allocation2 + $0x28] sm:$0xff]  ;;  %v329_v35 = vld [vmem:[#allocation5 + $0x50] sm:$0xff]  ;;  %v101_v38 = vmul.f32 %v876_v29, %v876_v29  ;;  %v110_v42 = vmul.f32 %v880_v33, %v880_v33 }
  0x2e   :  { %617 = vmatprep.subr.bf16.mxu0 %v616_v17  ;;  %645 = vmatprep.subr.bf16.mxu1 %v616_v17  ;;  %v628_v32 = vpack.c.bf16 %v328_v31, %v327_v30  ;;  %v330_v36 = vld [vmem:[#allocation5 + $0x58] sm:$0xff]  ;;  %v331_v40 = vld [vmem:[#allocation5 + $0x60] sm:$0xff]  ;;  %v332_v41 = vld [vmem:[#allocation5 + $0x68] sm:$0xff]  ;;  %v102_v43 = vmul.f32 %v882_v34, %v882_v34 }
  0x2f   :  { %129 = vadd.xlane.f32.xlu1 %v105_v4  ;;  %113 = vadd.xlane.f32.xlu0 %v97_v5  ;;  %v632_v39 = vpack.c.bf16 %v330_v36, %v329_v35  ;;  %v636_v44 = vpack.c.bf16 %v332_v41, %v331_v40  ;;  %v333_v45 = vld [vmem:[#allocation5 + $0x70] sm:$0xff]  ;;  %v334_v46 = vld [vmem:[#allocation5 + $0x78] sm:$0xff] }
  0x30   :  { %v640_v47 = vpack.c.bf16 %v334_v46, %v333_v45  ;;  %v894_v48 = vld [vmem:[#allocation2 + $0x70] sm:$0xff]  ;;  %v900_v50 = vld [vmem:[#allocation2 + $0x78] sm:$0xff] }
  0x31   :  { %619 = vmatpush3.bf16.msra.mxu0 %v616_v17  ;;  %653 = vmatpush3.bf16.msra.mxu1 %v616_v17  ;;  %v896_v49 = vld [vmem:[#allocation2 + $0x30] sm:$0xff]  ;;  %v902_v51 = vld [vmem:[#allocation2 + $0x38] sm:$0xff]  ;;  %v111_v52 = vmul.f32 %v894_v48, %v894_v48  ;;  %v112_v54 = vmul.f32 %v900_v50, %v900_v50 }
  0x32   :  { %621 = vmatprep.subr.bf16.mxu0 %v620_v24  ;;  %646 = vmatprep.subr.bf16.mxu1 %v620_v24  ;;  %v103_v53 = vmul.f32 %v896_v49, %v896_v49  ;;  %v104_v55 = vmul.f32 %v902_v51, %v902_v51 }
  0x33   :  { %131 = vadd.xlane.f32.xlu1 %v106_v6  ;;  %115 = vadd.xlane.f32.xlu0 %v98_v7 }
  0x35   :  { %623 = vmatpush3.bf16.msra.mxu0 %v620_v24  ;;  %654 = vmatpush3.bf16.msra.mxu1 %v620_v24 }
  0x36   :  { %625 = vmatprep.subr.bf16.mxu0 %v624_v27  ;;  %647 = vmatprep.subr.bf16.mxu1 %v624_v27 }
  0x37   :  { %85 = vadd.xlane.f32.xlu1 %v854_v8  ;;  %69 = vadd.xlane.f32.xlu0 %v856_v9 }
  0x39   :  { %627 = vmatpush3.bf16.msra.mxu0 %v624_v27  ;;  %655 = vmatpush3.bf16.msra.mxu1 %v624_v27 }
  0x3a   :  { %629 = vmatprep.subr.bf16.mxu0 %v628_v32  ;;  %648 = vmatprep.subr.bf16.mxu1 %v628_v32 }
  0x3b   :  { %87 = vadd.xlane.f32.xlu1 %v860_v13  ;;  %71 = vadd.xlane.f32.xlu0 %v862_v14 }
  0x3d   :  { %631 = vmatpush3.bf16.msra.mxu0 %v628_v32  ;;  %656 = vmatpush3.bf16.msra.mxu1 %v628_v32 }
  0x3e   :  { %633 = vmatprep.subr.bf16.mxu0 %v632_v39  ;;  %649 = vmatprep.subr.bf16.mxu1 %v632_v39 }
  0x3f   :  { %133 = vadd.xlane.f32.xlu1 %v107_v18  ;;  %117 = vadd.xlane.f32.xlu0 %v99_v19 }
  0x41   :  { %635 = vmatpush3.bf16.msra.mxu0 %v632_v39  ;;  %657 = vmatpush3.bf16.msra.mxu1 %v632_v39 }
  0x42   :  { %637 = vmatprep.subr.bf16.mxu0 %v636_v44  ;;  %650 = vmatprep.subr.bf16.mxu1 %v636_v44 }
  0x43   :  { %135 = vadd.xlane.f32.xlu1 %v108_v22  ;;  %119 = vadd.xlane.f32.xlu0 %v100_v23 }
  0x45   :  { %639 = vmatpush3.bf16.msra.mxu0 %v636_v44  ;;  %658 = vmatpush3.bf16.msra.mxu1 %v636_v44 }
  0x46   :  { %641 = vmatprep.subr.bf16.mxu0 %v640_v47  ;;  %651 = vmatprep.subr.bf16.mxu1 %v640_v47 }
  0x47   :  { %89 = vadd.xlane.f32.xlu1 %v874_v28  ;;  %73 = vadd.xlane.f32.xlu0 %v876_v29 }
  0x49   :  { %643 = vmatpush3.bf16.msra.mxu0 %v640_v47  ;;  %659 = vmatpush3.bf16.msra.mxu1 %v640_v47 }
  0x4b   :  { %91 = vadd.xlane.f32.xlu1 %v880_v33  ;;  %75 = vadd.xlane.f32.xlu0 %v882_v34 }
  0x4f   :  { %137 = vadd.xlane.f32.xlu1 %v109_v37  ;;  %121 = vadd.xlane.f32.xlu0 %v101_v38 }
  0x53   :  { %139 = vadd.xlane.f32.xlu1 %v110_v42  ;;  %123 = vadd.xlane.f32.xlu0 %v102_v43 }
  0x57   :  { %93 = vadd.xlane.f32.xlu1 %v894_v48  ;;  %77 = vadd.xlane.f32.xlu0 %v896_v49 }
  0x5b   :  { %95 = vadd.xlane.f32.xlu1 %v900_v50  ;;  %79 = vadd.xlane.f32.xlu0 %v902_v51 }
  0x5f   :  { %141 = vadd.xlane.f32.xlu1 %v111_v52  ;;  %125 = vadd.xlane.f32.xlu0 %v103_v53 }
  0x63   :  { %143 = vadd.xlane.f32.xlu1 %v112_v54  ;;  %127 = vadd.xlane.f32.xlu0 %v104_v55 }
  0xb4   :  { %v68_v56 = vpop.xlane.xlu1 %67  ;;  %v66_v57 = vpop.xlane.xlu0 %65 }
  0xb5   :  { %v145_v60 = vmul.f32 0.0078125, %v66_v57  ;;  %v914_v62 = vmul.f32 0.0078125, %v68_v56 }
  0xb7   :  { %v177_v6 = vmul.f32 %v145_v60, %v145_v60  ;;  %v178_v16 = vmul.f32 %v914_v62, %v914_v62  ;;  %v209_v38 = vsub.f32 %v836_v1, %v145_v60  ;;  %v939_v1 = vld [vmem:[%s1046_s1] ss:$0 sm:$0xff]  ;;  %v210_v54 = vsub.f32 %v834_v0, %v914_v62 }
  0xb8   :  { %v84_v58 = vpop.xlane.xlu1 %83  ;;  %v82_v59 = vpop.xlane.xlu0 %81 }
  0xb9   :  { %v153_v61 = vmul.f32 0.0078125, %v82_v59  ;;  %v916_v63 = vmul.f32 0.0078125, %v84_v58  ;;  %v946_v58 = vld [vmem:[%s1047_s2] ss:$0 sm:$0xff] }
  0xbb   :  { %v185_v7 = vmul.f32 %v153_v61, %v153_v61  ;;  %v186_v17 = vmul.f32 %v916_v63, %v916_v63  ;;  %v217_v39 = vsub.f32 %v842_v3, %v153_v61  ;;  %v218_v59 = vsub.f32 %v840_v2, %v916_v63 }
  0xbc   :  { %v130_v4 = vpop.xlane.xlu1 %129  ;;  %v114_v5 = vpop.xlane.xlu0 %113 }
  0xbd   :  { %v169_v10 = vmul.f32 0.0078125, %v130_v4  ;;  %v161_v11 = vmul.f32 0.0078125, %v114_v5 }
  0xbf   :  { %v201_v12 = vsub.f32 %v169_v10, %v185_v7  ;;  %v193_v15 = vsub.f32 %v161_v11, %v177_v6 }
  0xc0   :  { %v132_v18 = vpop.xlane.xlu1 %131  ;;  %v116_v19 = vpop.xlane.xlu0 %115 }
  0xc1   :  { %v233_v20 = vadd.f32 1e-05, %v201_v12  ;;  %v225_v21 = vadd.f32 1e-05, %v193_v15  ;;  %v170_v22 = vmul.f32 0.0078125, %v132_v18  ;;  %v162_v23 = vmul.f32 0.0078125, %v116_v19 }
  0xc3   :  { %665 = vrsqrt.f32 %v233_v20  ;;  %v202_v24 = vsub.f32 %v170_v22, %v186_v17  ;;  %v194_v25 = vsub.f32 %v162_v23, %v178_v16 }
  0xc4   :  { %667 = vrsqrt.f32 %v225_v21  ;;  %v86_v26 = vpop.xlane.xlu1 %85  ;;  %v70_v27 = vpop.xlane.xlu0 %69 }
  0xc5   :  { %v234_v30 = vadd.f32 1e-05, %v202_v24  ;;  %v226_v31 = vadd.f32 1e-05, %v194_v25  ;;  %v922_v36 = vmul.f32 0.0078125, %v86_v26  ;;  %v924_v37 = vmul.f32 0.0078125, %v70_v27 }
  0xc7   :  { %669 = vrsqrt.f32 %v234_v30  ;;  %v187_v45 = vmul.f32 %v922_v36, %v922_v36  ;;  %v179_v46 = vmul.f32 %v924_v37, %v924_v37 }
  0xc8   :  { %671 = vrsqrt.f32 %v226_v31  ;;  %v88_v32 = vpop.xlane.xlu1 %87  ;;  %v72_v35 = vpop.xlane.xlu0 %71 }
  0xc9   :  { %v928_v40 = vmul.f32 0.0078125, %v88_v32  ;;  %v930_v41 = vmul.f32 0.0078125, %v72_v35 }
  0xcb   :  { %v188_v60 = vmul.f32 %v928_v40, %v928_v40  ;;  %v180_v61 = vmul.f32 %v930_v41, %v930_v41 }
  0xcc   :  { %v134_v42 = vpop.xlane.xlu1 %133  ;;  %v118_v43 = vpop.xlane.xlu0 %117 }
  0xcd   :  { %v666_v44 = vpop.eup %665  ;;  %v171_v47 = vmul.f32 0.0078125, %v134_v42  ;;  %v163_v52 = vmul.f32 0.0078125, %v118_v43 }
  0xce   :  { %v668_v3 = vpop.eup %667  ;;  %v265_v53 = vmul.f32 %v666_v44, %v217_v39  ;;  %v211_v39 = vsub.f32 %v856_v9, %v924_v37  ;;  %v220_v9 = vsub.f32 %v860_v13, %v928_v40 }
  0xcf   :  { %v203_v55 = vsub.f32 %v171_v47, %v187_v45  ;;  %v195_v56 = vsub.f32 %v163_v52, %v179_v46  ;;  %v257_v57 = vmul.f32 %v668_v3, %v209_v38  ;;  %v219_v38 = vsub.f32 %v854_v8, %v922_v36 }
  0xd0   :  { %v136_v4 = vpop.xlane.xlu1 %135  ;;  %v120_v5 = vpop.xlane.xlu0 %119  ;;  %v288_v0 = vmul.f32 %v939_v1, %v265_v53 }
  0xd1   :  { %v670_v62 = vpop.eup %669  ;;  %v235_v6 = vadd.f32 1e-05, %v203_v55  ;;  %v227_v7 = vadd.f32 1e-05, %v195_v56  ;;  %v172_v10 = vmul.f32 0.0078125, %v136_v4  ;;  %v164_v11 = vmul.f32 0.0078125, %v120_v5 }
  0xd2   :  { %v672_v12 = vpop.eup %671  ;;  %v280_v15 = vmul.f32 %v939_v1, %v257_v57  ;;  %v311_v2 = vadd.f32 %v946_v58, %v288_v0  ;;  %v266_v63 = vmul.f32 %v670_v62, %v218_v59  ;;  %v212_v56 = vsub.f32 %v862_v14, %v930_v41 }
  0xd3   :  { %673 = vrsqrt.f32 %v235_v6  ;;  %v204_v16 = vsub.f32 %v172_v10, %v188_v60  ;;  %v196_v17 = vsub.f32 %v164_v11, %v180_v61  ;;  %v258_v18 = vmul.f32 %v672_v12, %v210_v54 }
  0xd4   :  { %675 = vrsqrt.f32 %v227_v7  ;;  %v90_v19 = vpop.xlane.xlu1 %89  ;;  %v303_v20 = vadd.f32 %v946_v58, %v280_v15  ;;  %600 = vmatprep.mubr.f32.mxu1 %v311_v2  ;;  %v74_v21 = vpop.xlane.xlu0 %73  ;;  %v289_v22 = vmul.f32 %v939_v1, %v266_v63 }
  0xd5   :  { %v236_v23 = vadd.f32 1e-05, %v204_v16  ;;  %v228_v24 = vadd.f32 1e-05, %v196_v17  ;;  %v281_v25 = vmul.f32 %v939_v1, %v258_v18  ;;  %v962_v32 = vmul.f32 0.0078125, %v90_v19 }
  0xd6   :  { %588 = vmatprep.mubr.f32.mxu0 %v303_v20  ;;  %v312_v26 = vadd.f32 %v946_v58, %v289_v22  ;;  %v964_v35 = vmul.f32 0.0078125, %v74_v21 }
  0xd7   :  { %677 = vrsqrt.f32 %v236_v23  ;;  %v304_v30 = vadd.f32 %v946_v58, %v281_v25  ;;  %v189_v47 = vmul.f32 %v962_v32, %v962_v32 }
  0xd8   :  { %679 = vrsqrt.f32 %v228_v24  ;;  %v92_v27 = vpop.xlane.xlu1 %91  ;;  %601 = vmatmul.mubr.f32.vlgmr.msra.gmra.mrb[0].mxu1 %v312_v26  ;;  %v76_v31 = vpop.xlane.xlu0 %75  ;;  %v181_v52 = vmul.f32 %v964_v35, %v964_v35  ;;  %v221_v26 = vsub.f32 %v874_v28, %v962_v32 }
  0xd9   :  { %589 = vmatmul.mubr.f32.vlgmr.msra.gmra.mrb[0].mxu0 %v304_v30  ;;  %v970_v42 = vmul.f32 0.0078125, %v92_v27  ;;  %v972_v43 = vmul.f32 0.0078125, %v76_v31  ;;  %v213_v27 = vsub.f32 %v876_v29, %v964_v35 }
  0xdb   :  { %v190_v57 = vmul.f32 %v970_v42, %v970_v42  ;;  %v182_v59 = vmul.f32 %v972_v43, %v972_v43  ;;  %v214_v29 = vsub.f32 %v882_v34, %v972_v43 }
  0xdc   :  { %v138_v44 = vpop.xlane.xlu1 %137  ;;  %v122_v45 = vpop.xlane.xlu0 %121 }
  0xdd   :  { %v674_v46 = vpop.eup %673  ;;  %v173_v3 = vmul.f32 0.0078125, %v138_v44  ;;  %v165_v53 = vmul.f32 0.0078125, %v122_v45 }
  0xde   :  { %v676_v54 = vpop.eup %675  ;;  %v267_v8 = vmul.f32 %v674_v46, %v219_v38 }
  0xdf   :  { %v205_v36 = vsub.f32 %v173_v3, %v189_v47  ;;  %v197_v37 = vsub.f32 %v165_v53, %v181_v52  ;;  %v259_v55 = vmul.f32 %v676_v54, %v211_v39  ;;  %v222_v54 = vsub.f32 %v880_v33, %v970_v42 }
  0xe0   :  { %v140_v60 = vpop.xlane.xlu1 %139  ;;  %v124_v61 = vpop.xlane.xlu0 %123  ;;  %v290_v4 = vmul.f32 %v939_v1, %v267_v8 }
  0xe1   :  { %v678_v5 = vpop.eup %677  ;;  %v237_v0 = vadd.f32 1e-05, %v205_v36  ;;  %v229_v62 = vadd.f32 1e-05, %v197_v37  ;;  %v174_v13 = vmul.f32 0.0078125, %v140_v60  ;;  %v166_v40 = vmul.f32 0.0078125, %v124_v61 }
  0xe2   :  { %v680_v6 = vpop.eup %679  ;;  %v282_v7 = vmul.f32 %v939_v1, %v259_v55  ;;  %v313_v14 = vadd.f32 %v946_v58, %v290_v4  ;;  %v268_v41 = vmul.f32 %v678_v5, %v220_v9 }
  0xe3   :  { %681 = vrsqrt.f32 %v237_v0  ;;  %v206_v10 = vsub.f32 %v174_v13, %v190_v57  ;;  %v198_v11 = vsub.f32 %v166_v40, %v182_v59  ;;  %v260_v12 = vmul.f32 %v680_v6, %v212_v56 }
  0xe4   :  { %683 = vrsqrt.f32 %v229_v62  ;;  %v94_v15 = vpop.xlane.xlu1 %93  ;;  %v305_v2 = vadd.f32 %v946_v58, %v282_v7  ;;  %603 = vmatprep.mubr.f32.mxu1 %v313_v14  ;;  %v78_v63 = vpop.xlane.xlu0 %77  ;;  %v291_v16 = vmul.f32 %v939_v1, %v268_v41 }
  0xe5   :  { %v238_v17 = vadd.f32 1e-05, %v206_v10  ;;  %v230_v18 = vadd.f32 1e-05, %v198_v11  ;;  %v283_v19 = vmul.f32 %v939_v1, %v260_v12  ;;  %v159_v24 = vmul.f32 0.0078125, %v94_v15 }
  0xe6   :  { %591 = vmatprep.mubr.f32.mxu0 %v305_v2  ;;  %v314_v20 = vadd.f32 %v946_v58, %v291_v16  ;;  %v151_v25 = vmul.f32 0.0078125, %v78_v63 }
  0xe7   :  { %685 = vrsqrt.f32 %v238_v17  ;;  %v306_v22 = vadd.f32 %v946_v58, %v283_v19  ;;  %v191_v45 = vmul.f32 %v159_v24, %v159_v24  ;;  %v223_v10 = vsub.f32 %v894_v48, %v159_v24 }
  0xe8   :  { %687 = vrsqrt.f32 %v230_v18  ;;  %v96_v21 = vpop.xlane.xlu1 %95  ;;  %604 = vmatmul.mubr.f32.gmra.mrb[2].mxu1 %v314_v20  ;;  %v80_v23 = vpop.xlane.xlu0 %79  ;;  %v183_v46 = vmul.f32 %v151_v25, %v151_v25  ;;  %v215_v12 = vsub.f32 %v896_v49, %v151_v25 }
  0xe9   :  { %592 = vmatmul.mubr.f32.gmra.mrb[2].mxu0 %v306_v22  ;;  %v160_v30 = vmul.f32 0.0078125, %v96_v21  ;;  %v998_v31 = vmul.f32 0.0078125, %v80_v23 }
  0xeb   :  { %v192_v35 = vmul.f32 %v160_v30, %v160_v30  ;;  %v184_v9 = vmul.f32 %v998_v31, %v998_v31  ;;  %v224_v16 = vsub.f32 %v900_v50, %v160_v30  ;;  %v216_v19 = vsub.f32 %v902_v51, %v998_v31  ;;  %v523_v51 = vld [vmem:[%s1049_s4] ss:$0 sm:$0xff]  ;;  %s773_s4 = smov [#allocation7]  }
  0xec   :  { %v142_v38 = vpop.xlane.xlu1 %141  ;;  %v126_v39 = vpop.xlane.xlu0 %125  ;;  %s508_s21 = sshll.u32 %s773_s4, 4  ;;  %s509_s21 = int_to_ptr.vmem [resolvable:$true] %s508_s21 }
  0xed   :  { %v682_v44 = vpop.eup %681  ;;  %v175_v47 = vmul.f32 0.0078125, %v142_v38  ;;  %v167_v52 = vmul.f32 0.0078125, %v126_v39  ;;  %s741_s22 = scalar_lea.vmem %s509_s21, 2048  ;;  %p746_p3 = scmp.lt.s32.totalorder %s509_s21, %s509_s21 }
  0xee   :  { %v684_v3 = vpop.eup %683  ;;  %v269_v53 = vmul.f32 %v682_v44, %v221_v26  ;;  %p742_p2 = scmp.ne.s32.totalorder %s509_s21, %s741_s22  ;;  %p747_p4 = scmp.lt.s32.totalorder %s741_s22, %s741_s22 }
  0xef   :  { %v207_v8 = vsub.f32 %v175_v47, %v191_v45  ;;  %v199_v28 = vsub.f32 %v167_v52, %v183_v46  ;;  %v261_v32 = vmul.f32 %v684_v3, %v213_v27 }
  0xf0   :  { %v144_v36 = vpop.xlane.xlu1 %143  ;;  %v128_v37 = vpop.xlane.xlu0 %127  ;;  %v292_v55 = vmul.f32 %v939_v1, %v269_v53  ;;  %p748_p5 = por %p747_p4, %p746_p3 }
  0xf1   :  { %v686_v56 = vpop.eup %685  ;;  %v239_v57 = vadd.f32 1e-05, %v207_v8  ;;  %v231_v59 = vadd.f32 1e-05, %v199_v28  ;;  %v176_v60 = vmul.f32 0.0078125, %v144_v36  ;;  %v168_v61 = vmul.f32 0.0078125, %v128_v37 }
  0xf2   :  { %v688_v33 = vpop.eup %687  ;;  %v284_v42 = vmul.f32 %v939_v1, %v261_v32  ;;  %v315_v4 = vadd.f32 %v946_v58, %v292_v55  ;;  %v270_v5 = vmul.f32 %v686_v56, %v222_v54  ;;  %p749_p6 = pnand %p748_p5, %p742_p2 }
  0xf3   :  { %689 = vrsqrt.f32 %v239_v57  ;;  %v208_v34 = vsub.f32 %v176_v60, %v192_v35  ;;  %v200_v43 = vsub.f32 %v168_v61, %v184_v9  ;;  %v262_v0 = vmul.f32 %v688_v33, %v214_v29 }
  0xf4   :  { %691 = vrsqrt.f32 %v231_v59  ;;  %v307_v62 = vadd.f32 %v946_v58, %v284_v42  ;;  %606 = vmatprep.mubr.f32.mxu1 %v315_v4  ;;  %v293_v13 = vmul.f32 %v939_v1, %v270_v5 }
  0xf5   :  { %v240_v40 = vadd.f32 1e-05, %v208_v34  ;;  %v232_v6 = vadd.f32 1e-05, %v200_v43  ;;  %v285_v7 = vmul.f32 %v939_v1, %v262_v0 }
  0xf6   :  { %594 = vmatprep.mubr.f32.mxu0 %v307_v62  ;;  %v316_v14 = vadd.f32 %v946_v58, %v293_v13 }
  0xf7   :  { %693 = vrsqrt.f32 %v240_v40  ;;  %v308_v41 = vadd.f32 %v946_v58, %v285_v7 }
  0xf8   :  { %695 = vrsqrt.f32 %v232_v6  ;;  %607 = vmatmul.mubr.f32.gmra.mrb[4].mxu1 %v316_v14 }
  0xf9   :  { %595 = vmatmul.mubr.f32.gmra.mrb[4].mxu0 %v308_v41 }
  0xfd   :  { %v690_v11 = vpop.eup %689 }
  0xfe   :  { %v692_v15 = vpop.eup %691  ;;  %v271_v2 = vmul.f32 %v690_v11, %v223_v10 }
  0xff   :  { %v263_v63 = vmul.f32 %v692_v15, %v215_v12 }
 0x100   :  { %v294_v17 = vmul.f32 %v939_v1, %v271_v2 }
 0x101   :  { %v694_v18 = vpop.eup %693  ;;  %v286_v20 = vmul.f32 %v939_v1, %v263_v63 }
 0x102   :  { %v696_v21 = vpop.eup %695  ;;  %v317_v22 = vadd.f32 %v946_v58, %v294_v17  ;;  %v272_v48 = vmul.f32 %v694_v18, %v224_v16 }
 0x103   :  { %v309_v23 = vadd.f32 %v946_v58, %v286_v20  ;;  %v264_v49 = vmul.f32 %v696_v21, %v216_v19 }
 0x104   :  { %609 = vmatprep.mubr.f32.mxu1 %v317_v22  ;;  %v295_v24 = vmul.f32 %v939_v1, %v272_v48 }
 0x105   :  { %597 = vmatprep.mubr.f32.mxu0 %v309_v23  ;;  %v287_v50 = vmul.f32 %v939_v1, %v264_v49 }
 0x106   :  { %v318_v25 = vadd.f32 %v946_v58, %v295_v24 }
 0x107   :  { %v310_v26 = vadd.f32 %v946_v58, %v287_v50 }
 0x108   :  { %610 = vmatmul.mubr.f32.gmra.mrb[6].mxu1 %v318_v25 }
 0x109   :  { %598 = vmatmul.mubr.f32.gmra.mrb[6].mxu0 %v310_v26 }
 0x1ab   :  { %v602_v27 = vpop.f32.mrb[0].mxu1 }
 0x1ac   :  { %v454_v30 = vadd.f32 %v602_v27, %v523_v51  ;;  %v448_v31 = vpop.f32.mrb[1].mxu1  ;;  %v590_v38 = vpop.f32.mrb[0].mxu0 }
 0x1ad   :  { %v449_v39 = vadd.f32 %v523_v51, %v448_v31  ;;  %v414_v44 = vadd.f32 %v590_v38, %v523_v51  ;;  %v408_v45 = vpop.f32.mrb[1].mxu0 }
 0x1ae   :  { %496 = vst [vmem:[#allocation7 + $0x48] sm:$0xff] %v454_v30  ;;  %v409_v46 = vadd.f32 %v523_v51, %v408_v45 }
 0x1af   :  { %495 = vst [vmem:[#allocation7 + $0x40] sm:$0xff] %v449_v39  ;;  %488 = vst [vmem:[#allocation7 + $0x8] sm:$0xff] %v414_v44 }
 0x1b0   :  { %487 = vst [vmem:[#allocation7] sm:$0xff] %v409_v46 }
 0x1bb   :  { %v605_v1 = vpop.f32.mrb[2].mxu1 }
 0x1bc   :  { %v464_v58 = vadd.f32 %v605_v1, %v523_v51  ;;  %v458_v47 = vpop.f32.mrb[3].mxu1  ;;  %v593_v52 = vpop.f32.mrb[2].mxu0 }
 0x1bd   :  { %v459_v3 = vadd.f32 %v523_v51, %v458_v47  ;;  %v424_v53 = vadd.f32 %v593_v52, %v523_v51  ;;  %v418_v54 = vpop.f32.mrb[3].mxu0 }
 0x1be   :  { %498 = vst [vmem:[#allocation7 + $0x58] sm:$0xff] %v464_v58  ;;  %v419_v8 = vadd.f32 %v523_v51, %v418_v54 }
 0x1bf   :  { %497 = vst [vmem:[#allocation7 + $0x50] sm:$0xff] %v459_v3  ;;  %490 = vst [vmem:[#allocation7 + $0x18] sm:$0xff] %v424_v53 }
 0x1c0   :  { %489 = vst [vmem:[#allocation7 + $0x10] sm:$0xff] %v419_v8 }
 0x1cb   :  { %v608_v28 = vpop.f32.mrb[4].mxu1 }
 0x1cc   :  { %v596_v32 = vpop.f32.mrb[4].mxu0  ;;  %v474_v29 = vadd.f32 %v608_v28, %v523_v51  ;;  %v468_v35 = vpop.f32.mrb[5].mxu1 }
 0x1cd   :  { %v434_v9 = vadd.f32 %v596_v32, %v523_v51  ;;  %v428_v36 = vpop.f32.mrb[5].mxu0  ;;  %v469_v37 = vadd.f32 %v523_v51, %v468_v35 }
 0x1ce   :  { %500 = vst [vmem:[#allocation7 + $0x68] sm:$0xff] %v474_v29  ;;  %v429_v55 = vadd.f32 %v523_v51, %v428_v36 }
 0x1cf   :  { %492 = vst [vmem:[#allocation7 + $0x28] sm:$0xff] %v434_v9  ;;  %499 = vst [vmem:[#allocation7 + $0x60] sm:$0xff] %v469_v37 }
 0x1d0   :  { %491 = vst [vmem:[#allocation7 + $0x20] sm:$0xff] %v429_v55 }
 0x1db   :  { %v611_v56 = vpop.f32.mrb[6].mxu1 }
 0x1dc   :  { %v599_v57 = vpop.f32.mrb[6].mxu0  ;;  %v484_v59 = vadd.f32 %v611_v56, %v523_v51  ;;  %v478_v60 = vpop.f32.mrb[7].mxu1 }
 0x1dd   :  { %v444_v61 = vadd.f32 %v599_v57, %v523_v51  ;;  %v438_v33 = vpop.f32.mrb[7].mxu0  ;;  %v479_v42 = vadd.f32 %v523_v51, %v478_v60 }
 0x1de   :  { %502 = vst [vmem:[#allocation7 + $0x78] sm:$0xff] %v484_v59  ;;  %v439_v4 = vadd.f32 %v523_v51, %v438_v33 }
 0x1df   :  { %494 = vst [vmem:[#allocation7 + $0x38] sm:$0xff] %v444_v61  ;;  %501 = vst [vmem:[#allocation7 + $0x70] sm:$0xff] %v479_v42 }
 0x1e0   :  { %493 = vst [vmem:[#allocation7 + $0x30] sm:$0xff] %v439_v4 }
 0x1e1   :  { %752 = shalt.err (!%p749_p6)
}
 0x1e2   :  { %s753_s25 = scalar_lea.hbm %s1050_s5, 2048 }
 0x1e3   :  { %p754_p7 = scmp.ne.s32.totalorder %s1050_s5, %s753_s25  ;;  %p757_p8 = scmp.lt.u32.totalorder %s753_s25, %s1050_s5 }
 0x1e5   :  { %p759_p9 = pnand %p757_p8, %p754_p7 }
 0x1e7   :  { %762 = shalt.err (!%p759_p9)
}
 0x1e8   :  { %514 = dma.vmem_to_hbm [thread:$0]  %s509_s21, 2048, %s1050_s5, [#allocation4], %s770_s28, %s770_s28, %s771_s29  }
 0x1e9   :  { %767 = dma.done.wait [#allocation4], 2048  }
 0x1ea   :  { %768 = vsyncadd [#allocation4], 4294965248 }
 0x1eb   :  { %518 = vsyncpa [#allocation3], 1 }
 0x1ec   :  { %519 = vsyncpa [#allocation6], 1 }
 0x1ed   :  { %520 = vsyncpa [#allocation4], 1 }

</bundles_post_ra>
